<compile_context>
chip_gen: v6e
topology: v6e:2x2x1
jax: 0.10.0
libtpu: 0.0.40
codegen_flags: <defaults>
</compile_context>

<pallas_src>
import jax
import jax.numpy as jnp
from jax.experimental import pallas as pl
from jax.experimental.pallas import tpu as pltpu

EPS = 1e-5  # PyTorch InstanceNorm2d default


def _round_up(x, m):
    return (x + m - 1) // m * m


def _cdiv(a, b):
    return (a + b - 1) // b


def _vmem_budget():
    """Generation-aware scoped-VMEM limit and per-step block budget (bytes)."""
    cap = 64 << 20  # conservative fallback == v7x per-TC VMEM
    try:
        info = pltpu.get_tpu_info()
        cap = int(getattr(info, "vmem_capacity_bytes", cap)) or cap
    except Exception:
        pass
    # 96 MiB scoped limit on 128-MiB chips (v5e/v6e), 48 MiB on v7x's 64 MiB.
    limit = max(32 << 20, min(cap * 3 // 4, 96 << 20))
    budget = int(limit * 0.70)  # headroom for compiler-internal scratch / semaphores
    return limit, budget


# --------------------------------------------------------------------------------------------
# Fused whole-HW kernel: conv (1x1) + InstanceNorm + ReLU in one grid step per (batch, C tile).
# --------------------------------------------------------------------------------------------
def _make_fused_kernel(nb, hw, eps):
    inv_hw = 1.0 / float(hw)

    def kernel(x_ref, w_ref, o_ref):
        # x_ref: (NB, C_in, HW) ; w_ref: (C_TILE, C_in) ; o_ref: (NB, C_TILE, HW)
        w = w_ref[...]

        def body(b, carry):
            xb = x_ref[b].astype(w.dtype)                                 # (C_in, HW)
            y = jnp.dot(w, xb, preferred_element_type=jnp.float32)        # MXU, f32 accumulate
            mean = jnp.sum(y, axis=-1, keepdims=True) * inv_hw
            d = y - mean
            var = jnp.sum(d * d, axis=-1, keepdims=True) * inv_hw         # two-pass variance
            o_ref[b] = jnp.maximum(d * jax.lax.rsqrt(var + eps), 0.0).astype(o_ref.dtype)
            return carry

        # fori_loop (unrolled) bounds live ranges per batch element while keeping LLO visibility.
        jax.lax.fori_loop(0, nb, body, None, unroll=True)

    return kernel


# --------------------------------------------------------------------------------------------
# Large-HW path, call 1: per-(n, c_out) spatial sums, HW as an "arbitrary" reduction grid axis
# with output-resident accumulators.
# --------------------------------------------------------------------------------------------
def _make_stats_kernel(hw, hw_tile):
    def kernel(x_ref, w_ref, s1_ref, s2_ref):
        h = pl.program_id(2)

        @pl.when(h == 0)
        def _():
            s1_ref[...] = jnp.zeros_like(s1_ref)
            s2_ref[...] = jnp.zeros_like(s2_ref)

        w = w_ref[...]
        y = jnp.dot(w, x_ref[0].astype(w.dtype), preferred_element_type=jnp.float32)
        # Mask lanes past the true HW in the (possibly ragged) last tile.
        col = jax.lax.broadcasted_iota(jnp.int32, y.shape, 1)
        y = jnp.where(h * hw_tile + col < hw, y, 0.0)
        s1_ref[0] += jnp.sum(y, axis=-1, keepdims=True)
        s2_ref[0] += jnp.sum(y * y, axis=-1, keepdims=True)

    return kernel


# --------------------------------------------------------------------------------------------
# Large-HW path, call 2: recompute the 1x1 conv per HW tile and apply precomputed scale/shift.
# --------------------------------------------------------------------------------------------
def _norm_kernel(x_ref, w_ref, scale_ref, shift_ref, o_ref):
    w = w_ref[...]
    y = jnp.dot(w, x_ref[0].astype(w.dtype), preferred_element_type=jnp.float32)
    o_ref[0] = jnp.maximum(y * scale_ref[0] + shift_ref[0], 0.0).astype(o_ref.dtype)


def conv_bn_relu(x_nchw, weight, bias=None, *, out_dtype=jnp.bfloat16,
                 force_hw_tiling=False, hw_tile_override=None):
    """ConvBnRelu forward: 1x1 conv (stride 1, pad 0) -> InstanceNorm2d(affine=False) -> ReLU.

    x_nchw: (N, C_in, H, W); weight: (C_out, C_in, 1, 1) or (C_out, C_in); bias: (C_out,) or None.
    The conv bias is mathematically cancelled by the InstanceNorm mean subtraction, so it is
    intentionally not used by the kernel (identical results, less HBM traffic).
    """
    # TODO(synk): only the module's default kernel_size=1, stride=1, padding=0 path is lowered
    # (a 1x1 conv == per-pixel channel matmul); general spatial convolutions are not implemented.
    del bias
    N, C_in, H, W = x_nchw.shape
    w2d = weight.reshape(weight.shape[0], -1)
    C_out = w2d.shape[0]
    assert w2d.shape[1] == C_in, "only 1x1 conv weights supported"
    HW = H * W

    compute_dtype = jnp.bfloat16 if x_nchw.dtype == jnp.bfloat16 else jnp.float32
    x_flat = x_nchw.reshape(N, C_in, HW)      # free reshape: no cast, no pad, no extra HBM pass
    x_bytes = jnp.dtype(x_flat.dtype).itemsize
    out_bytes = jnp.dtype(out_dtype).itemsize
    w_bytes = jnp.dtype(compute_dtype).itemsize

    vmem_limit, budget = _vmem_budget()

    # --- C_out tiling: minimize padding waste --------------------------------------------------
    c_out_8 = _round_up(C_out, 8)
    n_c = _cdiv(c_out_8, 256)
    C_TILE = _round_up(_cdiv(c_out_8, n_c), 8)

    def step_bytes(nb, c_tile, hw_blk):
        return (2 * nb * C_in * hw_blk * x_bytes        # x block, double-buffered
                + 2 * c_tile * C_in * w_bytes           # weight block, double-buffered
                + 2 * nb * c_tile * hw_blk * out_bytes  # out block, double-buffered
                + 3 * c_tile * hw_blk * 4)              # f32 MXU result + temporaries (1 live iter)

    # Shrink C_TILE (never below 128 / C_out) if a single whole-HW block would not otherwise fit.
    c_floor = min(c_out_8, 128)
    while step_bytes(1, C_TILE, HW) > budget and C_TILE > c_floor:
        C_TILE = max(c_floor, _round_up(_cdiv(C_TILE, 2), 8))
    C_out_pad = _round_up(c_out_8, C_TILE)
    c_tiles = C_out_pad // C_TILE

    # Padded weight rows are zero -> padded output rows are exactly 0 after norm+relu (no NaN).
    w_pad = jnp.zeros((C_out_pad, C_in), compute_dtype).at[:C_out].set(w2d.astype(compute_dtype))

    use_fused = (not force_hw_tiling) and step_bytes(1, C_TILE, HW) <= budget

    if use_fused:
        # Batch elements per grid step: largest divisor of N (<= 8) that fits the VMEM budget,
        # kept small enough that the parallel grid has >= 2 steps (both v7x TCs / megacore busy).
        nb_cap = min(N, 8)
        if c_tiles == 1 and N >= 2:
            nb_cap = min(nb_cap, N // 2)
        NB = 1
        for d in range(max(nb_cap, 1), 0, -1):
            if N % d == 0 and step_bytes(d, C_TILE, HW) <= budget:
                NB = d
                break
        grid = (N // NB, c_tiles)

        flops = 2 * N * C_out_pad * C_in * HW + 10 * N * C_out_pad * HW
        bytes_accessed = (x_flat.size * x_bytes + w_pad.size * w_bytes
                          + N * C_out_pad * HW * out_bytes)

        out_flat = pl.pallas_call(
            _make_fused_kernel(NB, HW, EPS),
            out_shape=jax.ShapeDtypeStruct((N, C_out_pad, HW), out_dtype),
            grid_spec=pltpu.PrefetchScalarGridSpec(
                num_scalar_prefetch=0,
                grid=grid,
                in_specs=[
                    pl.BlockSpec((NB, C_in, HW), lambda n, c: (n, 0, 0)),
                    pl.BlockSpec((C_TILE, C_in), lambda n, c: (c, 0)),
                ],
                out_specs=pl.BlockSpec((NB, C_TILE, HW), lambda n, c: (n, c, 0)),
            ),
            compiler_params=pltpu.CompilerParams(
                dimension_semantics=("parallel", "parallel"),
                vmem_limit_bytes=int(vmem_limit),
            ),
            cost_estimate=pl.CostEstimate(
                flops=int(flops),
                transcendentals=int(N * C_out_pad),
                bytes_accessed=int(bytes_accessed)),
        )(x_flat, w_pad)
        return out_flat[:, :C_out, :].reshape(N, C_out, H, W)

    # ---- large-HW path: stats reduction pass + normalize pass ---------------------------------
    if hw_tile_override is not None:
        HW_TILE = int(hw_tile_override)
    else:
        HW_TILE = 128
        hw_ceiling = _round_up(HW, 128)
        while HW_TILE * 2 <= hw_ceiling and step_bytes(1, C_TILE, HW_TILE * 2) <= budget:
            HW_TILE *= 2
    hw_tiles = _cdiv(HW, HW_TILE)
    grid3 = (N, c_tiles, hw_tiles)

    stats_shape = jax.ShapeDtypeStruct((N, C_out_pad, 1), jnp.float32)
    s1, s2 = pl.pallas_call(
        _make_stats_kernel(HW, HW_TILE),
        out_shape=(stats_shape, stats_shape),
        grid_spec=pltpu.PrefetchScalarGridSpec(
            num_scalar_prefetch=0,
            grid=grid3,
            in_specs=[
                pl.BlockSpec((1, C_in, HW_TILE), lambda n, c, h: (n, 0, h)),
                pl.BlockSpec((C_TILE, C_in), lambda n, c, h: (c, 0)),
            ],
            out_specs=(
                pl.BlockSpec((1, C_TILE, 1), lambda n, c, h: (n, c, 0)),
                pl.BlockSpec((1, C_TILE, 1), lambda n, c, h: (n, c, 0)),
            ),
        ),
        compiler_params=pltpu.CompilerParams(
            dimension_semantics=("parallel", "parallel", "arbitrary"),
            vmem_limit_bytes=int(vmem_limit),
        ),
        cost_estimate=pl.CostEstimate(
            flops=int(2 * N * C_out_pad * C_in * HW + 4 * N * C_out_pad * HW),
            transcendentals=0,
            bytes_accessed=int(x_flat.size * x_bytes + w_pad.size * w_bytes
                               + 2 * N * C_out_pad * 4)),
    )(x_flat, w_pad)

    # Tiny (N x C_out) per-channel epilogue outside the kernel (negligible vs the HW-sized work).
    # TODO(synk): one-pass E[y^2]-mean^2 is kept on the tiled path; the fused path uses two-pass.
    mean = s1 * (1.0 / HW)
    var = jnp.maximum(s2 * (1.0 / HW) - mean * mean, 0.0)
    scale = jax.lax.rsqrt(var + EPS)
    shift = -mean * scale

    out_flat = pl.pallas_call(
        _norm_kernel,
        out_shape=jax.ShapeDtypeStruct((N, C_out_pad, HW), out_dtype),
        grid_spec=pltpu.PrefetchScalarGridSpec(
            num_scalar_prefetch=0,
            grid=grid3,
            in_specs=[
                pl.BlockSpec((1, C_in, HW_TILE), lambda n, c, h: (n, 0, h)),
                pl.BlockSpec((C_TILE, C_in), lambda n, c, h: (c, 0)),
                pl.BlockSpec((1, C_TILE, 1), lambda n, c, h: (n, c, 0)),
                pl.BlockSpec((1, C_TILE, 1), lambda n, c, h: (n, c, 0)),
            ],
            out_specs=pl.BlockSpec((1, C_TILE, HW_TILE), lambda n, c, h: (n, c, h)),
        ),
        compiler_params=pltpu.CompilerParams(
            dimension_semantics=("parallel", "parallel", "parallel"),
            vmem_limit_bytes=int(vmem_limit),
        ),
        cost_estimate=pl.CostEstimate(
            flops=int(2 * N * C_out_pad * C_in * HW + 3 * N * C_out_pad * HW),
            transcendentals=0,
            bytes_accessed=int(x_flat.size * x_bytes + w_pad.size * w_bytes
                               + N * C_out_pad * HW * out_bytes)),
    )(x_flat, w_pad, scale, shift)
    return out_flat[:, :C_out, :].reshape(N, C_out, H, W)


def reference_f32(x_nchw, weight, bias):
    """Pure-JAX f32 reference matching the PyTorch module (conv + InstanceNorm2d + ReLU)."""
    N, C_in, H, W = x_nchw.shape
    w2d = weight.reshape(weight.shape[0], -1).astype(jnp.float32)
    x_flat = x_nchw.reshape(N, C_in, H * W).astype(jnp.float32)
    y = jnp.einsum("oc,ncs->nos", w2d, x_flat) + bias.astype(jnp.float32)[None, :, None]
    mean = jnp.mean(y, axis=-1, keepdims=True)
    var = jnp.mean((y - mean) ** 2, axis=-1, keepdims=True)
    y = (y - mean) / jnp.sqrt(var + EPS)
    y = jnp.maximum(y, 0.0)
    return y.reshape(N, weight.shape[0], H, W)


if __name__ == "__main__":
    key = jax.random.PRNGKey(0)
    k_x, k_w, k_b = jax.random.split(key, 3)

    N, C_in, C_out, H, W = 2, 4, 8, 16, 16

    x = jax.random.normal(k_x, (N, C_in, H, W), dtype=jnp.float32)
    # Deterministic synthetic params for Conv2d(in=4, out=8, kernel_size=1):
    bound = 1.0 / float(C_in) ** 0.5
    weight = jax.random.uniform(k_w, (C_out, C_in, 1, 1), jnp.float32, -bound, bound)
    bias = jax.random.uniform(k_b, (C_out,), jnp.float32, -bound, bound)

    ref = reference_f32(x, weight, bias)   # includes the bias the kernel drops (norm cancels it)

    # (1) Default path: fused whole-HW kernel, bf16 output (halved HBM writeback).
    out_bf16 = jax.block_until_ready(conv_bn_relu(x, weight, bias))
    assert out_bf16.shape == (N, C_out, H, W) and out_bf16.dtype == jnp.bfloat16
    assert bool(jnp.all(jnp.isfinite(out_bf16.astype(jnp.float32))))
    err = float(jnp.max(jnp.abs(out_bf16.astype(jnp.float32) - ref)))
    assert err < 5e-2, f"bf16-output mismatch vs f32 reference: {err}"

    # (2) f32 output: tighter check of the fused path against the PyTorch-semantics reference.
    out_f32 = jax.block_until_ready(conv_bn_relu(x, weight, bias, out_dtype=jnp.float32))
    err = float(jnp.max(jnp.abs(out_f32 - ref)))
    assert err < 2e-2, f"f32-output mismatch vs f32 reference: {err}"

    # (3) Large-HW tiled path (stats pass + normalize pass), forced at this small shape so the
    #     code path is exercised and validated.
    out_tiled = jax.block_until_ready(
        conv_bn_relu(x, weight, bias, out_dtype=jnp.float32,
                     force_hw_tiling=True, hw_tile_override=128))
    err = float(jnp.max(jnp.abs(out_tiled - ref)))
    assert err < 2e-2, f"tiled-path mismatch vs f32 reference: {err}"

    print("KERNEL_OK")
</pallas_src>

<mosaic_0001>
module attributes {stable_mosaic.version = 11 : i64} {
  func.func @kernel(%arg0: i32, %arg1: i32, %arg2: memref<1x4x256xf32, #tpu.memory_space<vmem>>, %arg3: memref<8x4xf32, #tpu.memory_space<vmem>>, %arg4: memref<1x8x256xbf16, #tpu.memory_space<vmem>>) attributes {dimension_semantics = [#tpu.dimension_semantics<parallel>, #tpu.dimension_semantics<parallel>], iteration_bounds = array<i64: 2, 1>, scalar_prefetch = 0 : i64, scratch_operands = 0 : i64, tpu.core_type = #tpu.core_type<tc>, window_params = [{transform_indices = @transform_0, window_bounds = array<i64: 1, 4, 256>}, {transform_indices = @transform_1, window_bounds = array<i64: 8, 4>}, {transform_indices = @transform_2, window_bounds = array<i64: 1, 8, 256>}]} {
    %c0 = arith.constant 0 : index
    %c0_0 = arith.constant 0 : index
    %0 = vector.load %arg3[%c0, %c0_0] : memref<8x4xf32, #tpu.memory_space<vmem>>, vector<8x4xf32>
    %c0_i32 = arith.constant 0 : i32
    %1 = arith.index_cast %c0_i32 : i32 to index
    %c0_1 = arith.constant 0 : index
    %c0_2 = arith.constant 0 : index
    %2 = vector.load %arg2[%1, %c0_1, %c0_2] : memref<1x4x256xf32, #tpu.memory_space<vmem>>, vector<1x4x256xf32>
    %3 = vector.shape_cast %2 : vector<1x4x256xf32> to vector<4x256xf32>
    %cst = arith.constant dense<0.000000e+00> : vector<8x256xf32>
    %4 = tpu.matmul %0, %3, %cst {dimension_numbers = #tpu.dot_dimension_numbers<[1], [0], [0], [1], [0, 0, 1, 1], [], []>} : vector<8x4xf32>, vector<4x256xf32>, vector<8x256xf32> -> vector<8x256xf32>
    %cst_3 = arith.constant dense<0.000000e+00> : vector<8xf32>
    %5 = vector.multi_reduction <add>, %4, %cst_3 [1] : vector<8x256xf32> to vector<8xf32>
    %6 = vector.shape_cast %5 : vector<8xf32> to vector<8x1xf32>
    %cst_4 = arith.constant 3.906250e-03 : f32
    %7 = vector.broadcast %cst_4 : f32 to vector<8x1xf32>
    %8 = arith.mulf %6, %7 : vector<8x1xf32>
    %9 = vector.broadcast %8 : vector<8x1xf32> to vector<8x256xf32>
    %10 = arith.subf %4, %9 : vector<8x256xf32>
    %11 = arith.mulf %10, %10 : vector<8x256xf32>
    %cst_5 = arith.constant dense<0.000000e+00> : vector<8xf32>
    %12 = vector.multi_reduction <add>, %11, %cst_5 [1] : vector<8x256xf32> to vector<8xf32>
    %13 = vector.shape_cast %12 : vector<8xf32> to vector<8x1xf32>
    %cst_6 = arith.constant 3.906250e-03 : f32
    %14 = vector.broadcast %cst_6 : f32 to vector<8x1xf32>
    %15 = arith.mulf %13, %14 : vector<8x1xf32>
    %cst_7 = arith.constant 9.99999974E-6 : f32
    %16 = vector.broadcast %cst_7 : f32 to vector<8x1xf32>
    %17 = arith.addf %15, %16 : vector<8x1xf32>
    %18 = math.rsqrt %17 : vector<8x1xf32>
    %19 = vector.broadcast %18 : vector<8x1xf32> to vector<8x256xf32>
    %20 = arith.mulf %10, %19 : vector<8x256xf32>
    %cst_8 = arith.constant 0.000000e+00 : f32
    %21 = vector.broadcast %cst_8 : f32 to vector<8x256xf32>
    %22 = arith.maximumf %20, %21 : vector<8x256xf32>
    %23 = arith.truncf %22 : vector<8x256xf32> to vector<8x256xbf16>
    %24 = arith.index_cast %c0_i32 : i32 to index
    %c0_9 = arith.constant 0 : index
    %c0_10 = arith.constant 0 : index
    %25 = vector.load %arg4[%24, %c0_9, %c0_10] : memref<1x8x256xbf16, #tpu.memory_space<vmem>>, vector<1x8x256xbf16>
    %26 = vector.shape_cast %25 : vector<1x8x256xbf16> to vector<8x256xbf16>
    %27 = vector.shape_cast %23 : vector<8x256xbf16> to vector<1x8x256xbf16>
    tpu.vector_store %arg4[%24, %c0_9, %c0_10], %27 {strides = array<i32>} : memref<1x8x256xbf16, #tpu.memory_space<vmem>>, vector<1x8x256xbf16>,
    %c1_i32 = arith.constant 1 : i32
    return
  }
  func.func @transform_0(%arg0: i32, %arg1: i32) -> (i32, i32, i32) {
    %c0_i32 = arith.constant 0 : i32
    %c0_i32_0 = arith.constant 0 : i32
    %c0_i32_1 = arith.constant 0 : i32
    return %arg0, %c0_i32, %c0_i32_0 : i32, i32, i32
  }
  func.func @transform_1(%arg0: i32, %arg1: i32) -> (i32, i32) {
    %c0_i32 = arith.constant 0 : i32
    %c0_i32_0 = arith.constant 0 : i32
    return %arg1, %c0_i32 : i32, i32
  }
  func.func @transform_2(%arg0: i32, %arg1: i32) -> (i32, i32, i32) {
    %c0_i32 = arith.constant 0 : i32
    %c0_i32_0 = arith.constant 0 : i32
    return %arg0, %arg1, %c0_i32 : i32, i32, i32
  }
}

</mosaic_0001>

<bundles_post_ra>
// kernel: tpu_custom_call.1
= control target key start
LH: loop header
LB: loop body
LE: loop exit
PB: predicated region body
PF: predicated region fallthrough
CT: control target
= control target key end

     0   :  { %7 = vsyncpa [#allocation3], 0  ;;  %s773_s0 = inlined_call_operand.hbm [shape: f32[2,4,256], index: 0, kind: input, shape index: {}]   ;;  %s774_s1 = inlined_call_operand.vmem [shape: f32[8,4], index: 1, kind: input, shape index: {}]   ;;  %s775_s2 = inlined_call_operand.hbm [shape: bf16[2,8,256], index: 2, kind: output, shape index: {}]  }
   0x1   :  { %9 = vsyncpa [#allocation3 + $0x1], 0 }
   0x2   :  { %10 = vsyncpa [#allocation4], 0 }
   0x3   :  { %12 = vsyncpa [#allocation4 + $0x1], 0  ;;  %s632_s9 = smov 0   ;;  %s634_s10 = smov 0  }
   0x4   :  { %s636_s11 = smov 0   ;;  %s638_s12 = smov 0  }
   0x5   :  { %s640_s13 = smov 0   ;;  %s642_s14 = smov 0  }
   0x6 LB: > { %s415_s15 = sadd.s32 4294967295, %s612_s14   ;;  %s416_s16 = sadd.s32 4294967294, %s612_s14   ;;  %s612_s14 = sphi %s642_s14, %s18_s14   ;;  %s608_s13 = sphi %s640_s13, %s787_s13   ;;  %s604_s12 = sphi %s638_s12, %s786_s12   ;;  %s600_s11 = sphi %s636_s11, %s785_s11   ;;  %s596_s10 = sphi %s634_s10, %s784_s10   ;;  %s592_s9 = sphi %s632_s9, %s783_s9  }
   0x7   : > { %s30_s17 = sadd.s32 1, %s608_s13  ;;  %s37_s18 = sadd.s32 1, %s600_s11 }
   0x8   : > { %p32_p0 = scmp.ge.s32.totalorder %s30_s17, 2  ;;  %p44_p1 = scmp.ne.s32.totalorder %s600_s11, %s596_s10 }
   0x9   : > { %p45_p2 = scmp.eq.s32.totalorder %s612_s14, 0  ;;  %p50_p3 = scmp.ne.s32.totalorder %s596_s10, %s592_s9 }
   0xa   : > { %s789_s17 = smov (%p32_p0, %s30_s17), 0  ;;  %p51_p5 = scmp.eq.s32.totalorder %s415_s15, 0 }
   0xb   : > { %p673_p4 = por %p45_p2, %p44_p1  ;;  %s34_s20 = ssub.s32 %s608_s13, %s789_s17 }
   0xc   : > { %p102_p6 = scmp.eq.s32.totalorder %s415_s15, 1  ;;  %p35_p7 = scmp.eq.s32.totalorder %s34_s20, 0 }
   0xd   : > { %p679_p8 = por %p51_p5, %p50_p3  ;;  %p108_p10 = scmp.eq.s32.totalorder %s416_s16, 1 }
   0xe   : > { %p683_p9 = por %p102_p6, %p44_p1  ;;  %p450_p13 = scmp.lt.s32.totalorder %s612_s14, 2 }
   0xf   : > { %s688_s23 = scalar_select %p35_p7, %s600_s11, %s37_s18  }
  0x10   : > { %p690_p11 = por %p108_p10, %p50_p3  ;;  %s135_s25 = sand.u32 1, %s600_s11  }
  0x11   : > { %s420_s26 = sshll.u32 %s135_s25, 3  ;;  %s435_s27 = sshll.u32 %s608_s13, 7 }
  0x12   : > { %s779_s24 = scalar_select %p690_p11, 1, 0 }
  0x13   : > { %s145_s30 = scalar_lea.hbm %s773_s0, %s435_s27  ;;  %s139_s3 = scalar_lea.vmem [#allocation2], %s420_s26 }
  0x14   : > { %s147_s4 = sshll.u32 %s139_s3, 4  ;;  %p703_p0 = pnand %p450_p13, %p673_p4  ;;  %s148_s4 = int_to_ptr.vmem [resolvable:$true] %s147_s4 }
  0x15   : > { %p423_p1 = scmp.ge.s32.totalorder %s612_s14, 1  ;;  %p152_p2 = scmp.lt.s32.totalorder %s612_s14, 3 }
  0x16   : > { %s136_s6 = scalar_lea.sflag [#allocation3], %s135_s25  ;;  %p506_p3 = pneg %p703_p0 }
  0x17   : > { %s517_s7 = scalar_lea.vmem %s148_s4, 128  ;;  %s614_s8 = smov [#allocation2]  }
  0x18   : > { %p518_p5 = scmp.ne.s32.totalorder %s148_s4, %s517_s7  ;;  %s522_s15 = sshll.u32 %s614_s8, 4  ;;  %s523_s15 = int_to_ptr.vmem [resolvable:$false] %s522_s15 }
  0x19   : > { %s524_s16 = scalar_lea.vmem %s523_s15, 256  ;;  %p525_p10 = scmp.lt.s32.totalorder %s148_s4, %s523_s15 }
  0x1a   : > { %p520_p6 = pnand %p518_p5, %p506_p3  ;;  %p526_p12 = scmp.lt.s32.totalorder %s524_s16, %s517_s7 }
  0x1c   : > { %p521_p7 = pneg %p520_p6  ;;  %p527_p4 = por %p526_p12, %p525_p10 }
  0x1e   : > { %p528_p13 = pnand %p527_p4, %p521_p7 }
  0x20   : > { %531 = shalt.err (!%p528_p13)
}
  0x21   : > { %445 = dma.hbm_to_vmem [thread:$0]  (!%p703_p0), %s145_s30, 128, %s148_s4, %s136_s6  }
  0x22   : > { %p153_p11 = pnand %p423_p1, %p152_p2 }
  0x23   : > { %s718_s18 = sand.u32 (!%p153_p11), 1, %s596_s10  }
  0x24   : > { %156 = sbr.rel (%p153_p11) target bundleno = 565 (0x235), region = 28  ;;  %s424_s19 = sshll.u32 (!%p153_p11), %s718_s18, 3 }
  0x25   : > { %s159_s20 = scalar_lea.sflag (!%p153_p11), [#allocation3], %s718_s18  ;;  %s162_s25 = scalar_lea.vmem (!%p153_p11), [#allocation2], %s424_s19 }
  0x29   : > { %583 = dma.done.wait (%p679_p8), %s159_s20, 128  }
  0x2a   : > { %585 = vsyncadd (%p679_p8), %s159_s20, 4294967168  ;;  %v615_v0 = vmov 0.0   ;;  %v192_v1 = vld [vmem:[%s162_s25] sm:$0xff]  ;;  %vm199_vm0 = vcmask 1043456   ;;  %vm195_vm1 = vcmask 31744   ;;  %s437_s21 = sshll.u32 %s604_s12, 7 }
  0x2b   : > { %268 = vmatprep.mubr.f32.mxu0 %v615_v0  ;;  %v194_v2 = vcombine.high %v192_v1, %v192_v1  ;;  %v191_v3 = vld [vmem:[%s774_s1] sm:$0xff]  ;;  %s186_s28 = scalar_lea.vmem [#allocation5], %s424_s19  ;;  %s317_s4 = scalar_lea.hbm %s775_s2, %s437_s21 }
  0x2c   : > { %s319_s29 = sshll.u32 %s186_s28, 4  ;;  %s303_s5 = scalar_lea.sflag [#allocation4], %s718_s18  ;;  %s320_s29 = int_to_ptr.vmem [resolvable:$true] %s319_s29 }
  0x2d   : > { %426 = vmatprep.subr.msk.mxu0 %vm199_vm0, %v194_v2  ;;  %s532_s6 = scalar_lea.vmem %s320_s29, 128  ;;  %s616_s7 = smov [#allocation5]  }
  0x2e   : > { %427 = vmatpush1.msk.msra.mxu0 %vm199_vm0, %v192_v1  ;;  %p533_p8 = scmp.ne.s32.totalorder %s320_s29, %s532_s6  ;;  %s536_s12 = sshll.u32 %s616_s7, 4  ;;  %s537_s12 = int_to_ptr.vmem [resolvable:$false] %s536_s12 }
  0x2f   : > { %428 = vmatmul.mubr.msk.f32.vlgmr.msra.gmra.mxu0 %vm195_vm1, %v191_v3  ;;  %s538_s8 = scalar_lea.vmem %s537_s12, 256  ;;  %p539_p0 = scmp.lt.s32.totalorder %s320_s29, %s537_s12 }
  0x30   : > { %p534_p11 = pnand %p533_p8, %p683_p9  ;;  %p540_p1 = scmp.lt.s32.totalorder %s538_s8, %s532_s6 }
  0x32   : > { %p535_p12 = pneg %p534_p11  ;;  %p541_p2 = por %p540_p1, %p539_p0 }
  0x34   : > { %p542_p3 = pnand %p541_p2, %p535_p12 }
  0xef   : > { %v270_v4 = vpop.f32.mrf.mxu0 }
  0xf1   : > { %v272_v5 = vpop.f32.mrf.mxu0 }
  0xf2   : > { %v275_v6 = vadd.f32 %v272_v5, %v270_v4 }
  0xf4   : > { %276 = vadd.xlane.f32.xlu0 %v275_v6 }
 0x17d   : > { %v277_v7 = vpop.xlane.xlu0 %276 }
 0x17e   : > { %v278_v8 = vmul.f32 0.00390625, %v277_v7 }
 0x180   : > { %v279_v9 = vsub.f32 %v270_v4, %v278_v8  ;;  %v280_v10 = vsub.f32 %v272_v5, %v278_v8 }
 0x182   : > { %v281_v11 = vmul.f32 %v279_v9, %v279_v9  ;;  %v282_v12 = vmul.f32 %v280_v10, %v280_v10 }
 0x184   : > { %v283_v13 = vadd.f32 %v282_v12, %v281_v11 }
 0x186   : > { %284 = vadd.xlane.f32.xlu0 %v283_v13 }
 0x20f   : > { %v285_v14 = vpop.xlane.xlu0 %284 }
 0x210   : > { %v286_v15 = vmul.f32 0.00390625, %v285_v14 }
 0x212   : > { %v287_v16 = vadd.f32 1e-05, %v286_v15 }
 0x214   : > { %502 = vrsqrt.f32 %v287_v16 }
 0x221   : > { %v503_v17 = vpop.eup %502 }
 0x222   : > { %v289_v18 = vmul.f32 %v503_v17, %v279_v9  ;;  %v290_v19 = vmul.f32 %v503_v17, %v280_v10 }
 0x224   : > { %v291_v20 = vmax.f32 %v289_v18, 0.0  ;;  %v292_v21 = vmax.f32 %v290_v19, 0.0 }
 0x226   : > { %v436_v22 = vpack.c.bf16 %v292_v21, %v291_v20 }
 0x228   : > { %301 = vst [vmem:[%s186_s28] sm:$0xff] %v436_v22 }
 0x229   : > { %545 = shalt.err (!%p542_p3)
}
 0x22a   : > { %s546_s15 = scalar_lea.hbm %s317_s4, 128  ;;  %s550_s19 = scalar_lea.hbm %s775_s2, 256 }
 0x22b   : > { %p547_p5 = scmp.ne.s32.totalorder %s317_s4, %s546_s15  ;;  %p551_p10 = scmp.lt.s32.totalorder %s317_s4, %s775_s2 }
 0x22c   : > { %p552_p4 = scmp.lt.s32.totalorder %s550_s19, %s546_s15 }
 0x22d   : > { %p548_p6 = pnand %p547_p5, %p683_p9 }
 0x22e   : > { %p553_p13 = por %p552_p4, %p551_p10 }
 0x22f   : > { %p549_p7 = pneg %p548_p6 }
 0x231   : > { %p554_p8 = pnand %p553_p13, %p549_p7 }
 0x233   : > { %557 = shalt.err (!%p554_p8)
}
 0x234   : > { %440 = dma.vmem_to_hbm [thread:$0]  (%p683_p9), %s320_s29, 128, %s317_s4, %s303_s5  }
 0x235 PF: > { %s331_s26 = sand.u32 1, %s592_s9   ;;  %p781_p11 = scmp.ne.s32.totalorder %s779_s24, 0 }
 0x236   : > { %p782_p12 = scmp.ge.s32.totalorder %s612_s14, 2  ;;  %s332_s27 = scalar_lea.sflag [#allocation4], %s331_s26 }
 0x238   : > { %p447_p0 = pnand %p782_p12, %p781_p11 }
 0x23a   : > { %p448_p1 = pneg %p447_p0 }
 0x23c   : > { %587 = dma.done.wait (%p448_p1), %s332_s27, 128  }
 0x23d   : > { %589 = vsyncadd (%p448_p1), %s332_s27, 4294967168  ;;  %s18_s14 = sadd.s32 1, %s612_s14   ;;  %s783_s9 = smov %s596_s10 }
 0x23e   : > { %p15_p2 = scmp.ge.s32.totalorder %s18_s14, 4   ;;  %s784_s10 = smov %s600_s11 }
 0x23f   : > { %s785_s11 = smov %s688_s23  ;;  %s786_s12 = smov %s608_s13 }
 0x240   : > { %s787_s13 = smov %s789_s17  ;;  %17 = sbr.rel (!%p15_p2) target bundleno = 6 (0x6), region = 76 }
 0x245   :  { %337 = vsyncpa [#allocation3], 1 }
 0x246   :  { %339 = vsyncpa [#allocation3 + $0x1], 1 }
 0x247   :  { %340 = vsyncpa [#allocation4], 1 }
 0x248   :  { %342 = vsyncpa [#allocation4 + $0x1], 1 }

</bundles_post_ra>
